<compile_context>
chip_gen: v6e
topology: v6e:2x2x1
jax: 0.10.0
libtpu: 0.0.40
codegen_flags: <defaults>
</compile_context>

<pallas_src>
from math import pi, sqrt

import numpy as np
import jax
import jax.numpy as jnp
from jax.experimental import pallas as pl
from jax.experimental.pallas import tpu as pltpu

# ---------------- static configuration (small shapes) ----------------
NUM_WKS = 4            # num_WKs (Laplace wavelet channels)
LEN_WKS = 16           # len_WKs
BATCH = 4
SIG_LEN = 64           # waveform length L

# Laplace_fast kernel-size logic: ks = len-1, +1 if len even  (=> ks always even)
KS = (LEN_WKS - 1) + (1 if LEN_WKS % 2 == 0 else 0)        # 16
PAD = (KS - 1) // 2                                         # 7
L_OUT = SIG_LEN + 2 * PAD - KS + 1                          # 63

# ---------------- Laplace wavelet constants ----------------
A_AMP = 0.08
EP = 0.03
TAL = 0.1
FREQ = 50.0
W_ANG = 2.0 * pi * FREQ
GAMMA = EP / sqrt(1.0 - EP * EP)        # ep / sqrt(q)

# Tap-index-dependent factors, baked at trace time.  With theta[k,c] = alpha_k - beta_c
# (alpha_k = w*(t_k - tal), beta_c = w*b_c/a_c):
#   filt[k,c] = A*exp(-g*theta)*(-sin(theta))
#             = exp(g*beta_c) * (P_k*cos(beta_c) + Q_k*sin(beta_c))
#   P_k = -A*exp(-g*alpha_k)*sin(alpha_k),  Q_k = A*exp(-g*alpha_k)*cos(alpha_k)
_t_disc = np.arange(KS, dtype=np.float64) / (KS - 1)        # torch.linspace(0, 1, KS)
_alpha = W_ANG * (_t_disc - TAL)
_envelope = A_AMP * np.exp(-GAMMA * _alpha)
TAPS_NP = np.stack([-_envelope * np.sin(_alpha),
                    _envelope * np.cos(_alpha)], axis=1).astype(np.float32)   # (KS, 2)


# ---------------- Pallas kernel: fused filter build + 16-tap conv1d ----------------
def lwk_kernel(params_ref, taps_ref, x_ref, out_ref):
    """params_ref: (3, C) rows = [beta, sin(beta), cos(beta)], beta = w*b/a per channel
       taps_ref:   (KS, 2) baked per-tap constants [P_k, Q_k]
       x_ref:      (B, L) waveforms
       out_ref:    (B, C*L_OUT) lane-dense conv output
    """
    # --- rebuild the (KS, C) Laplace filter bank: only exp / mul / add ---
    prm = params_ref[...]                            # (3, C)
    beta = prm[0:1, :]                               # (1, C)
    sinb = prm[1:2, :]                               # (1, C)
    cosb = prm[2:3, :]                               # (1, C)
    tp = taps_ref[...]                               # (KS, 2)
    p_tap = tp[:, 0:1]                               # (KS, 1)
    q_tap = tp[:, 1:2]                               # (KS, 1)
    envel = jnp.exp(GAMMA * beta)                    # (1, C)  exp(gamma * w * b/a)  (EUP)
    filt = (p_tap * cosb + q_tap * sinb) * envel     # (KS, C)

    # --- zero-padded waveform (conv padding baked in, value-level lane concat) ---
    x = x_ref[...]                                   # (B, L)
    zpad = jnp.zeros((BATCH, PAD), jnp.float32)
    xpad = jnp.concatenate([zpad, x, zpad], axis=-1) # (B, L + 2*PAD)

    # --- direct conv: KS statically-unrolled scalar-broadcast MACs per channel ---
    windows = [xpad[:, k:k + L_OUT] for k in range(KS)]   # KS static (B, L_OUT) slices
    chans = []
    for c in range(NUM_WKS):
        acc = filt[0:1, c:c + 1] * windows[0]
        for k in range(1, KS):
            acc = acc + filt[k:k + 1, c:c + 1] * windows[k]
        chans.append(acc)                            # (B, L_OUT)

    # single lane-dense store of all channels
    out_ref[...] = jnp.concatenate(chans, axis=-1)   # (B, C*L_OUT)


# ---------------- wrapper ----------------
@jax.jit
def lwk_forward(waveforms, a_, b_):
    # waveforms: (B, 1, L) float32, in_channels == 1;  a_, b_: (C, 1) parameters.
    x = waveforms[:, 0, :]                                    # (B, L)

    # Per-channel phases beta = w*b/a and their sin/cos: 12 floats, one fused XLA op.
    # TODO(synk): jnp.sin/cos of the 4 channel phases stay in the wrapper - Mosaic
    # lowering of sin/cos inside the kernel is not guaranteed on all TPU generations;
    # the sin(a-b) identity split keeps the kernel to exp/mul/add with identical math.
    beta = W_ANG * (b_ / a_)[:, 0]                            # (C,)
    params = jnp.stack([beta, jnp.sin(beta), jnp.cos(beta)], axis=0)   # (3, C)

    vmem = pl.BlockSpec(memory_space=pltpu.MemorySpace.VMEM)
    modes_flat = pl.pallas_call(
        lwk_kernel,
        out_shape=jax.ShapeDtypeStruct((BATCH, NUM_WKS * L_OUT), jnp.float32),
        in_specs=[vmem, vmem, vmem],
        out_specs=vmem,
        cost_estimate=pl.CostEstimate(
            flops=2 * BATCH * NUM_WKS * KS * L_OUT,
            transcendentals=NUM_WKS,
            bytes_accessed=(3 * NUM_WKS + KS * 2 + BATCH * SIG_LEN
                            + BATCH * NUM_WKS * L_OUT) * 4),
    )(params, jnp.asarray(TAPS_NP), x)

    # Lane-dense kernel output; free contiguous reshape to PyTorch (B, C, L_OUT).
    return modes_flat.reshape(BATCH, NUM_WKS, L_OUT)


# ---------------- pure-JAX reference (mirrors the PyTorch module exactly) ----------------
def reference_forward(waveforms, a_, b_):
    x = waveforms[:, 0, :]
    time_disc = jnp.linspace(0.0, 1.0, KS)
    p1 = time_disc[None, :] - (b_ / a_)                       # (C, KS)
    wp = W_ANG * (p1 - TAL)
    filt = (A_AMP * jnp.exp(-GAMMA * wp) * -jnp.sin(wp)).astype(jnp.float32)
    xp = jnp.pad(x, ((0, 0), (PAD, PAD)))
    modes = jnp.zeros((BATCH, NUM_WKS, L_OUT), jnp.float32)
    for k in range(KS):                                       # cross-correlation (F.conv1d)
        modes = modes + filt[None, :, k, None] * xp[:, None, k:k + L_OUT]
    return modes


if __name__ == "__main__":
    key = jax.random.PRNGKey(0)
    waveforms = jax.random.normal(key, (BATCH, 1, SIG_LEN), jnp.float32)

    # Laplace_fast parameter initialization (deterministic, exactly as in __init__)
    a_ = jnp.linspace(1.0, 10.0, NUM_WKS).astype(jnp.float32).reshape(-1, 1)   # (C, 1)
    b_ = jnp.linspace(0.0, 10.0, NUM_WKS).astype(jnp.float32).reshape(-1, 1)   # (C, 1)

    modes = lwk_forward(waveforms, a_, b_)
    jax.block_until_ready(modes)

    modes_r = reference_forward(waveforms, a_, b_)
    modes_np, modes_r_np = np.asarray(modes), np.asarray(modes_r)

    # Filter magnitudes reach ~2.5e3; scale the absolute tolerance by the data range.
    scale = float(np.max(np.abs(modes_r_np))) + 1e-12
    np.testing.assert_allclose(modes_np, modes_r_np, rtol=5e-3, atol=5e-3 * scale)

    assert modes.shape == (BATCH, NUM_WKS, L_OUT)
    print("KERNEL_OK")
</pallas_src>

<mosaic_0001>
module attributes {stable_mosaic.version = 11 : i64} {
  func.func @lwk_kernel(%arg0: memref<3x4xf32, #tpu.memory_space<vmem>>, %arg1: memref<16x2xf32, #tpu.memory_space<vmem>>, %arg2: memref<4x64xf32, #tpu.memory_space<vmem>>, %arg3: memref<4x252xf32, #tpu.memory_space<vmem>>) attributes {dimension_semantics = [], scalar_prefetch = 0 : i64, scratch_operands = 0 : i64, tpu.core_type = #tpu.core_type<tc>} {
    %c0 = arith.constant 0 : index
    %c0_0 = arith.constant 0 : index
    %0 = vector.load %arg0[%c0, %c0_0] : memref<3x4xf32, #tpu.memory_space<vmem>>, vector<3x4xf32>
    %1 = vector.extract_strided_slice %0 {offsets = [0, 0], sizes = [1, 4], strides = [1, 1]} : vector<3x4xf32> to vector<1x4xf32>
    %2 = vector.extract_strided_slice %0 {offsets = [1, 0], sizes = [1, 4], strides = [1, 1]} : vector<3x4xf32> to vector<1x4xf32>
    %3 = vector.extract_strided_slice %0 {offsets = [2, 0], sizes = [1, 4], strides = [1, 1]} : vector<3x4xf32> to vector<1x4xf32>
    %c0_1 = arith.constant 0 : index
    %c0_2 = arith.constant 0 : index
    %4 = vector.load %arg1[%c0_1, %c0_2] : memref<16x2xf32, #tpu.memory_space<vmem>>, vector<16x2xf32>
    %5 = vector.extract_strided_slice %4 {offsets = [0, 0], sizes = [16, 1], strides = [1, 1]} : vector<16x2xf32> to vector<16x1xf32>
    %6 = vector.extract_strided_slice %4 {offsets = [0, 1], sizes = [16, 1], strides = [1, 1]} : vector<16x2xf32> to vector<16x1xf32>
    %cst = arith.constant 0.0300135091 : f32
    %7 = vector.broadcast %cst : f32 to vector<1x4xf32>
    %8 = arith.mulf %7, %1 : vector<1x4xf32>
    %9 = math.exp %8 : vector<1x4xf32>
    %10 = vector.broadcast %5 : vector<16x1xf32> to vector<16x4xf32>
    %11 = vector.broadcast %3 : vector<1x4xf32> to vector<16x4xf32>
    %12 = arith.mulf %10, %11 : vector<16x4xf32>
    %13 = vector.broadcast %6 : vector<16x1xf32> to vector<16x4xf32>
    %14 = vector.broadcast %2 : vector<1x4xf32> to vector<16x4xf32>
    %15 = arith.mulf %13, %14 : vector<16x4xf32>
    %16 = arith.addf %12, %15 : vector<16x4xf32>
    %17 = vector.broadcast %9 : vector<1x4xf32> to vector<16x4xf32>
    %18 = arith.mulf %16, %17 : vector<16x4xf32>
    %c0_3 = arith.constant 0 : index
    %c0_4 = arith.constant 0 : index
    %19 = vector.load %arg2[%c0_3, %c0_4] : memref<4x64xf32, #tpu.memory_space<vmem>>, vector<4x64xf32>
    %cst_5 = arith.constant 0.000000e+00 : f32
    %20 = vector.broadcast %cst_5 : f32 to vector<4x7xf32>
    %21 = tpu.concatenate %20, %19, %20 in 1 : vector<4x7xf32>, vector<4x64xf32>, vector<4x7xf32> -> vector<4x78xf32>
    %22 = vector.extract_strided_slice %21 {offsets = [0, 0], sizes = [4, 63], strides = [1, 1]} : vector<4x78xf32> to vector<4x63xf32>
    %23 = vector.extract_strided_slice %21 {offsets = [0, 1], sizes = [4, 63], strides = [1, 1]} : vector<4x78xf32> to vector<4x63xf32>
    %24 = vector.extract_strided_slice %21 {offsets = [0, 2], sizes = [4, 63], strides = [1, 1]} : vector<4x78xf32> to vector<4x63xf32>
    %25 = vector.extract_strided_slice %21 {offsets = [0, 3], sizes = [4, 63], strides = [1, 1]} : vector<4x78xf32> to vector<4x63xf32>
    %26 = vector.extract_strided_slice %21 {offsets = [0, 4], sizes = [4, 63], strides = [1, 1]} : vector<4x78xf32> to vector<4x63xf32>
    %27 = vector.extract_strided_slice %21 {offsets = [0, 5], sizes = [4, 63], strides = [1, 1]} : vector<4x78xf32> to vector<4x63xf32>
    %28 = vector.extract_strided_slice %21 {offsets = [0, 6], sizes = [4, 63], strides = [1, 1]} : vector<4x78xf32> to vector<4x63xf32>
    %29 = vector.extract_strided_slice %21 {offsets = [0, 7], sizes = [4, 63], strides = [1, 1]} : vector<4x78xf32> to vector<4x63xf32>
    %30 = vector.extract_strided_slice %21 {offsets = [0, 8], sizes = [4, 63], strides = [1, 1]} : vector<4x78xf32> to vector<4x63xf32>
    %31 = vector.extract_strided_slice %21 {offsets = [0, 9], sizes = [4, 63], strides = [1, 1]} : vector<4x78xf32> to vector<4x63xf32>
    %32 = vector.extract_strided_slice %21 {offsets = [0, 10], sizes = [4, 63], strides = [1, 1]} : vector<4x78xf32> to vector<4x63xf32>
    %33 = vector.extract_strided_slice %21 {offsets = [0, 11], sizes = [4, 63], strides = [1, 1]} : vector<4x78xf32> to vector<4x63xf32>
    %34 = vector.extract_strided_slice %21 {offsets = [0, 12], sizes = [4, 63], strides = [1, 1]} : vector<4x78xf32> to vector<4x63xf32>
    %35 = vector.extract_strided_slice %21 {offsets = [0, 13], sizes = [4, 63], strides = [1, 1]} : vector<4x78xf32> to vector<4x63xf32>
    %36 = vector.extract_strided_slice %21 {offsets = [0, 14], sizes = [4, 63], strides = [1, 1]} : vector<4x78xf32> to vector<4x63xf32>
    %37 = vector.extract_strided_slice %21 {offsets = [0, 15], sizes = [4, 63], strides = [1, 1]} : vector<4x78xf32> to vector<4x63xf32>
    %38 = vector.extract_strided_slice %18 {offsets = [0, 0], sizes = [1, 1], strides = [1, 1]} : vector<16x4xf32> to vector<1x1xf32>
    %39 = vector.broadcast %38 : vector<1x1xf32> to vector<4x63xf32>
    %40 = arith.mulf %39, %22 : vector<4x63xf32>
    %41 = vector.extract_strided_slice %18 {offsets = [1, 0], sizes = [1, 1], strides = [1, 1]} : vector<16x4xf32> to vector<1x1xf32>
    %42 = vector.broadcast %41 : vector<1x1xf32> to vector<4x63xf32>
    %43 = arith.mulf %42, %23 : vector<4x63xf32>
    %44 = arith.addf %40, %43 : vector<4x63xf32>
    %45 = vector.extract_strided_slice %18 {offsets = [2, 0], sizes = [1, 1], strides = [1, 1]} : vector<16x4xf32> to vector<1x1xf32>
    %46 = vector.broadcast %45 : vector<1x1xf32> to vector<4x63xf32>
    %47 = arith.mulf %46, %24 : vector<4x63xf32>
    %48 = arith.addf %44, %47 : vector<4x63xf32>
    %49 = vector.extract_strided_slice %18 {offsets = [3, 0], sizes = [1, 1], strides = [1, 1]} : vector<16x4xf32> to vector<1x1xf32>
    %50 = vector.broadcast %49 : vector<1x1xf32> to vector<4x63xf32>
    %51 = arith.mulf %50, %25 : vector<4x63xf32>
    %52 = arith.addf %48, %51 : vector<4x63xf32>
    %53 = vector.extract_strided_slice %18 {offsets = [4, 0], sizes = [1, 1], strides = [1, 1]} : vector<16x4xf32> to vector<1x1xf32>
    %54 = vector.broadcast %53 : vector<1x1xf32> to vector<4x63xf32>
    %55 = arith.mulf %54, %26 : vector<4x63xf32>
    %56 = arith.addf %52, %55 : vector<4x63xf32>
    %57 = vector.extract_strided_slice %18 {offsets = [5, 0], sizes = [1, 1], strides = [1, 1]} : vector<16x4xf32> to vector<1x1xf32>
    %58 = vector.broadcast %57 : vector<1x1xf32> to vector<4x63xf32>
    %59 = arith.mulf %58, %27 : vector<4x63xf32>
    %60 = arith.addf %56, %59 : vector<4x63xf32>
    %61 = vector.extract_strided_slice %18 {offsets = [6, 0], sizes = [1, 1], strides = [1, 1]} : vector<16x4xf32> to vector<1x1xf32>
    %62 = vector.broadcast %61 : vector<1x1xf32> to vector<4x63xf32>
    %63 = arith.mulf %62, %28 : vector<4x63xf32>
    %64 = arith.addf %60, %63 : vector<4x63xf32>
    %65 = vector.extract_strided_slice %18 {offsets = [7, 0], sizes = [1, 1], strides = [1, 1]} : vector<16x4xf32> to vector<1x1xf32>
    %66 = vector.broadcast %65 : vector<1x1xf32> to vector<4x63xf32>
    %67 = arith.mulf %66, %29 : vector<4x63xf32>
    %68 = arith.addf %64, %67 : vector<4x63xf32>
    %69 = vector.extract_strided_slice %18 {offsets = [8, 0], sizes = [1, 1], strides = [1, 1]} : vector<16x4xf32> to vector<1x1xf32>
    %70 = vector.broadcast %69 : vector<1x1xf32> to vector<4x63xf32>
    %71 = arith.mulf %70, %30 : vector<4x63xf32>
    %72 = arith.addf %68, %71 : vector<4x63xf32>
    %73 = vector.extract_strided_slice %18 {offsets = [9, 0], sizes = [1, 1], strides = [1, 1]} : vector<16x4xf32> to vector<1x1xf32>
    %74 = vector.broadcast %73 : vector<1x1xf32> to vector<4x63xf32>
    %75 = arith.mulf %74, %31 : vector<4x63xf32>
    %76 = arith.addf %72, %75 : vector<4x63xf32>
    %77 = vector.extract_strided_slice %18 {offsets = [10, 0], sizes = [1, 1], strides = [1, 1]} : vector<16x4xf32> to vector<1x1xf32>
    %78 = vector.broadcast %77 : vector<1x1xf32> to vector<4x63xf32>
    %79 = arith.mulf %78, %32 : vector<4x63xf32>
    %80 = arith.addf %76, %79 : vector<4x63xf32>
    %81 = vector.extract_strided_slice %18 {offsets = [11, 0], sizes = [1, 1], strides = [1, 1]} : vector<16x4xf32> to vector<1x1xf32>
    %82 = vector.broadcast %81 : vector<1x1xf32> to vector<4x63xf32>
    %83 = arith.mulf %82, %33 : vector<4x63xf32>
    %84 = arith.addf %80, %83 : vector<4x63xf32>
    %85 = vector.extract_strided_slice %18 {offsets = [12, 0], sizes = [1, 1], strides = [1, 1]} : vector<16x4xf32> to vector<1x1xf32>
    %86 = vector.broadcast %85 : vector<1x1xf32> to vector<4x63xf32>
    %87 = arith.mulf %86, %34 : vector<4x63xf32>
    %88 = arith.addf %84, %87 : vector<4x63xf32>
    %89 = vector.extract_strided_slice %18 {offsets = [13, 0], sizes = [1, 1], strides = [1, 1]} : vector<16x4xf32> to vector<1x1xf32>
    %90 = vector.broadcast %89 : vector<1x1xf32> to vector<4x63xf32>
    %91 = arith.mulf %90, %35 : vector<4x63xf32>
    %92 = arith.addf %88, %91 : vector<4x63xf32>
    %93 = vector.extract_strided_slice %18 {offsets = [14, 0], sizes = [1, 1], strides = [1, 1]} : vector<16x4xf32> to vector<1x1xf32>
    %94 = vector.broadcast %93 : vector<1x1xf32> to vector<4x63xf32>
    %95 = arith.mulf %94, %36 : vector<4x63xf32>
    %96 = arith.addf %92, %95 : vector<4x63xf32>
    %97 = vector.extract_strided_slice %18 {offsets = [15, 0], sizes = [1, 1], strides = [1, 1]} : vector<16x4xf32> to vector<1x1xf32>
    %98 = vector.broadcast %97 : vector<1x1xf32> to vector<4x63xf32>
    %99 = arith.mulf %98, %37 : vector<4x63xf32>
    %100 = arith.addf %96, %99 : vector<4x63xf32>
    %101 = vector.extract_strided_slice %18 {offsets = [0, 1], sizes = [1, 1], strides = [1, 1]} : vector<16x4xf32> to vector<1x1xf32>
    %102 = vector.broadcast %101 : vector<1x1xf32> to vector<4x63xf32>
    %103 = arith.mulf %102, %22 : vector<4x63xf32>
    %104 = vector.extract_strided_slice %18 {offsets = [1, 1], sizes = [1, 1], strides = [1, 1]} : vector<16x4xf32> to vector<1x1xf32>
    %105 = vector.broadcast %104 : vector<1x1xf32> to vector<4x63xf32>
    %106 = arith.mulf %105, %23 : vector<4x63xf32>
    %107 = arith.addf %103, %106 : vector<4x63xf32>
    %108 = vector.extract_strided_slice %18 {offsets = [2, 1], sizes = [1, 1], strides = [1, 1]} : vector<16x4xf32> to vector<1x1xf32>
    %109 = vector.broadcast %108 : vector<1x1xf32> to vector<4x63xf32>
    %110 = arith.mulf %109, %24 : vector<4x63xf32>
    %111 = arith.addf %107, %110 : vector<4x63xf32>
    %112 = vector.extract_strided_slice %18 {offsets = [3, 1], sizes = [1, 1], strides = [1, 1]} : vector<16x4xf32> to vector<1x1xf32>
    %113 = vector.broadcast %112 : vector<1x1xf32> to vector<4x63xf32>
    %114 = arith.mulf %113, %25 : vector<4x63xf32>
    %115 = arith.addf %111, %114 : vector<4x63xf32>
    %116 = vector.extract_strided_slice %18 {offsets = [4, 1], sizes = [1, 1], strides = [1, 1]} : vector<16x4xf32> to vector<1x1xf32>
    %117 = vector.broadcast %116 : vector<1x1xf32> to vector<4x63xf32>
    %118 = arith.mulf %117, %26 : vector<4x63xf32>
    %119 = arith.addf %115, %118 : vector<4x63xf32>
    %120 = vector.extract_strided_slice %18 {offsets = [5, 1], sizes = [1, 1], strides = [1, 1]} : vector<16x4xf32> to vector<1x1xf32>
    %121 = vector.broadcast %120 : vector<1x1xf32> to vector<4x63xf32>
    %122 = arith.mulf %121, %27 : vector<4x63xf32>
    %123 = arith.addf %119, %122 : vector<4x63xf32>
    %124 = vector.extract_strided_slice %18 {offsets = [6, 1], sizes = [1, 1], strides = [1, 1]} : vector<16x4xf32> to vector<1x1xf32>
    %125 = vector.broadcast %124 : vector<1x1xf32> to vector<4x63xf32>
    %126 = arith.mulf %125, %28 : vector<4x63xf32>
    %127 = arith.addf %123, %126 : vector<4x63xf32>
    %128 = vector.extract_strided_slice %18 {offsets = [7, 1], sizes = [1, 1], strides = [1, 1]} : vector<16x4xf32> to vector<1x1xf32>
    %129 = vector.broadcast %128 : vector<1x1xf32> to vector<4x63xf32>
    %130 = arith.mulf %129, %29 : vector<4x63xf32>
    %131 = arith.addf %127, %130 : vector<4x63xf32>
    %132 = vector.extract_strided_slice %18 {offsets = [8, 1], sizes = [1, 1], strides = [1, 1]} : vector<16x4xf32> to vector<1x1xf32>
    %133 = vector.broadcast %132 : vector<1x1xf32> to vector<4x63xf32>
    %134 = arith.mulf %133, %30 : vector<4x63xf32>
    %135 = arith.addf %131, %134 : vector<4x63xf32>
    %136 = vector.extract_strided_slice %18 {offsets = [9, 1], sizes = [1, 1], strides = [1, 1]} : vector<16x4xf32> to vector<1x1xf32>
    %137 = vector.broadcast %136 : vector<1x1xf32> to vector<4x63xf32>
    %138 = arith.mulf %137, %31 : vector<4x63xf32>
    %139 = arith.addf %135, %138 : vector<4x63xf32>
    %140 = vector.extract_strided_slice %18 {offsets = [10, 1], sizes = [1, 1], strides = [1, 1]} : vector<16x4xf32> to vector<1x1xf32>
    %141 = vector.broadcast %140 : vector<1x1xf32> to vector<4x63xf32>
    %142 = arith.mulf %141, %32 : vector<4x63xf32>
    %143 = arith.addf %139, %142 : vector<4x63xf32>
    %144 = vector.extract_strided_slice %18 {offsets = [11, 1], sizes = [1, 1], strides = [1, 1]} : vector<16x4xf32> to vector<1x1xf32>
    %145 = vector.broadcast %144 : vector<1x1xf32> to vector<4x63xf32>
    %146 = arith.mulf %145, %33 : vector<4x63xf32>
    %147 = arith.addf %143, %146 : vector<4x63xf32>
    %148 = vector.extract_strided_slice %18 {offsets = [12, 1], sizes = [1, 1], strides = [1, 1]} : vector<16x4xf32> to vector<1x1xf32>
    %149 = vector.broadcast %148 : vector<1x1xf32> to vector<4x63xf32>
    %150 = arith.mulf %149, %34 : vector<4x63xf32>
    %151 = arith.addf %147, %150 : vector<4x63xf32>
    %152 = vector.extract_strided_slice %18 {offsets = [13, 1], sizes = [1, 1], strides = [1, 1]} : vector<16x4xf32> to vector<1x1xf32>
    %153 = vector.broadcast %152 : vector<1x1xf32> to vector<4x63xf32>
    %154 = arith.mulf %153, %35 : vector<4x63xf32>
    %155 = arith.addf %151, %154 : vector<4x63xf32>
    %156 = vector.extract_strided_slice %18 {offsets = [14, 1], sizes = [1, 1], strides = [1, 1]} : vector<16x4xf32> to vector<1x1xf32>
    %157 = vector.broadcast %156 : vector<1x1xf32> to vector<4x63xf32>
    %158 = arith.mulf %157, %36 : vector<4x63xf32>
    %159 = arith.addf %155, %158 : vector<4x63xf32>
    %160 = vector.extract_strided_slice %18 {offsets = [15, 1], sizes = [1, 1], strides = [1, 1]} : vector<16x4xf32> to vector<1x1xf32>
    %161 = vector.broadcast %160 : vector<1x1xf32> to vector<4x63xf32>
    %162 = arith.mulf %161, %37 : vector<4x63xf32>
    %163 = arith.addf %159, %162 : vector<4x63xf32>
    %164 = vector.extract_strided_slice %18 {offsets = [0, 2], sizes = [1, 1], strides = [1, 1]} : vector<16x4xf32> to vector<1x1xf32>
    %165 = vector.broadcast %164 : vector<1x1xf32> to vector<4x63xf32>
    %166 = arith.mulf %165, %22 : vector<4x63xf32>
    %167 = vector.extract_strided_slice %18 {offsets = [1, 2], sizes = [1, 1], strides = [1, 1]} : vector<16x4xf32> to vector<1x1xf32>
    %168 = vector.broadcast %167 : vector<1x1xf32> to vector<4x63xf32>
    %169 = arith.mulf %168, %23 : vector<4x63xf32>
    %170 = arith.addf %166, %169 : vector<4x63xf32>
    %171 = vector.extract_strided_slice %18 {offsets = [2, 2], sizes = [1, 1], strides = [1, 1]} : vector<16x4xf32> to vector<1x1xf32>
    %172 = vector.broadcast %171 : vector<1x1xf32> to vector<4x63xf32>
    %173 = arith.mulf %172, %24 : vector<4x63xf32>
    %174 = arith.addf %170, %173 : vector<4x63xf32>
    %175 = vector.extract_strided_slice %18 {offsets = [3, 2], sizes = [1, 1], strides = [1, 1]} : vector<16x4xf32> to vector<1x1xf32>
    %176 = vector.broadcast %175 : vector<1x1xf32> to vector<4x63xf32>
    %177 = arith.mulf %176, %25 : vector<4x63xf32>
    %178 = arith.addf %174, %177 : vector<4x63xf32>
    %179 = vector.extract_strided_slice %18 {offsets = [4, 2], sizes = [1, 1], strides = [1, 1]} : vector<16x4xf32> to vector<1x1xf32>
    %180 = vector.broadcast %179 : vector<1x1xf32> to vector<4x63xf32>
    %181 = arith.mulf %180, %26 : vector<4x63xf32>
    %182 = arith.addf %178, %181 : vector<4x63xf32>
    %183 = vector.extract_strided_slice %18 {offsets = [5, 2], sizes = [1, 1], strides = [1, 1]} : vector<16x4xf32> to vector<1x1xf32>
    %184 = vector.broadcast %183 : vector<1x1xf32> to vector<4x63xf32>
    %185 = arith.mulf %184, %27 : vector<4x63xf32>
    %186 = arith.addf %182, %185 : vector<4x63xf32>
    %187 = vector.extract_strided_slice %18 {offsets = [6, 2], sizes = [1, 1], strides = [1, 1]} : vector<16x4xf32> to vector<1x1xf32>
    %188 = vector.broadcast %187 : vector<1x1xf32> to vector<4x63xf32>
    %189 = arith.mulf %188, %28 : vector<4x63xf32>
    %190 = arith.addf %186, %189 : vector<4x63xf32>
    %191 = vector.extract_strided_slice %18 {offsets = [7, 2], sizes = [1, 1], strides = [1, 1]} : vector<16x4xf32> to vector<1x1xf32>
    %192 = vector.broadcast %191 : vector<1x1xf32> to vector<4x63xf32>
    %193 = arith.mulf %192, %29 : vector<4x63xf32>
    %194 = arith.addf %190, %193 : vector<4x63xf32>
    %195 = vector.extract_strided_slice %18 {offsets = [8, 2], sizes = [1, 1], strides = [1, 1]} : vector<16x4xf32> to vector<1x1xf32>
    %196 = vector.broadcast %195 : vector<1x1xf32> to vector<4x63xf32>
    %197 = arith.mulf %196, %30 : vector<4x63xf32>
    %198 = arith.addf %194, %197 : vector<4x63xf32>
    %199 = vector.extract_strided_slice %18 {offsets = [9, 2], sizes = [1, 1], strides = [1, 1]} : vector<16x4xf32> to vector<1x1xf32>
    %200 = vector.broadcast %199 : vector<1x1xf32> to vector<4x63xf32>
    %201 = arith.mulf %200, %31 : vector<4x63xf32>
    %202 = arith.addf %198, %201 : vector<4x63xf32>
    %203 = vector.extract_strided_slice %18 {offsets = [10, 2], sizes = [1, 1], strides = [1, 1]} : vector<16x4xf32> to vector<1x1xf32>
    %204 = vector.broadcast %203 : vector<1x1xf32> to vector<4x63xf32>
    %205 = arith.mulf %204, %32 : vector<4x63xf32>
    %206 = arith.addf %202, %205 : vector<4x63xf32>
    %207 = vector.extract_strided_slice %18 {offsets = [11, 2], sizes = [1, 1], strides = [1, 1]} : vector<16x4xf32> to vector<1x1xf32>
    %208 = vector.broadcast %207 : vector<1x1xf32> to vector<4x63xf32>
    %209 = arith.mulf %208, %33 : vector<4x63xf32>
    %210 = arith.addf %206, %209 : vector<4x63xf32>
    %211 = vector.extract_strided_slice %18 {offsets = [12, 2], sizes = [1, 1], strides = [1, 1]} : vector<16x4xf32> to vector<1x1xf32>
    %212 = vector.broadcast %211 : vector<1x1xf32> to vector<4x63xf32>
    %213 = arith.mulf %212, %34 : vector<4x63xf32>
    %214 = arith.addf %210, %213 : vector<4x63xf32>
    %215 = vector.extract_strided_slice %18 {offsets = [13, 2], sizes = [1, 1], strides = [1, 1]} : vector<16x4xf32> to vector<1x1xf32>
    %216 = vector.broadcast %215 : vector<1x1xf32> to vector<4x63xf32>
    %217 = arith.mulf %216, %35 : vector<4x63xf32>
    %218 = arith.addf %214, %217 : vector<4x63xf32>
    %219 = vector.extract_strided_slice %18 {offsets = [14, 2], sizes = [1, 1], strides = [1, 1]} : vector<16x4xf32> to vector<1x1xf32>
    %220 = vector.broadcast %219 : vector<1x1xf32> to vector<4x63xf32>
    %221 = arith.mulf %220, %36 : vector<4x63xf32>
    %222 = arith.addf %218, %221 : vector<4x63xf32>
    %223 = vector.extract_strided_slice %18 {offsets = [15, 2], sizes = [1, 1], strides = [1, 1]} : vector<16x4xf32> to vector<1x1xf32>
    %224 = vector.broadcast %223 : vector<1x1xf32> to vector<4x63xf32>
    %225 = arith.mulf %224, %37 : vector<4x63xf32>
    %226 = arith.addf %222, %225 : vector<4x63xf32>
    %227 = vector.extract_strided_slice %18 {offsets = [0, 3], sizes = [1, 1], strides = [1, 1]} : vector<16x4xf32> to vector<1x1xf32>
    %228 = vector.broadcast %227 : vector<1x1xf32> to vector<4x63xf32>
    %229 = arith.mulf %228, %22 : vector<4x63xf32>
    %230 = vector.extract_strided_slice %18 {offsets = [1, 3], sizes = [1, 1], strides = [1, 1]} : vector<16x4xf32> to vector<1x1xf32>
    %231 = vector.broadcast %230 : vector<1x1xf32> to vector<4x63xf32>
    %232 = arith.mulf %231, %23 : vector<4x63xf32>
    %233 = arith.addf %229, %232 : vector<4x63xf32>
    %234 = vector.extract_strided_slice %18 {offsets = [2, 3], sizes = [1, 1], strides = [1, 1]} : vector<16x4xf32> to vector<1x1xf32>
    %235 = vector.broadcast %234 : vector<1x1xf32> to vector<4x63xf32>
    %236 = arith.mulf %235, %24 : vector<4x63xf32>
    %237 = arith.addf %233, %236 : vector<4x63xf32>
    %238 = vector.extract_strided_slice %18 {offsets = [3, 3], sizes = [1, 1], strides = [1, 1]} : vector<16x4xf32> to vector<1x1xf32>
    %239 = vector.broadcast %238 : vector<1x1xf32> to vector<4x63xf32>
    %240 = arith.mulf %239, %25 : vector<4x63xf32>
    %241 = arith.addf %237, %240 : vector<4x63xf32>
    %242 = vector.extract_strided_slice %18 {offsets = [4, 3], sizes = [1, 1], strides = [1, 1]} : vector<16x4xf32> to vector<1x1xf32>
    %243 = vector.broadcast %242 : vector<1x1xf32> to vector<4x63xf32>
    %244 = arith.mulf %243, %26 : vector<4x63xf32>
    %245 = arith.addf %241, %244 : vector<4x63xf32>
    %246 = vector.extract_strided_slice %18 {offsets = [5, 3], sizes = [1, 1], strides = [1, 1]} : vector<16x4xf32> to vector<1x1xf32>
    %247 = vector.broadcast %246 : vector<1x1xf32> to vector<4x63xf32>
    %248 = arith.mulf %247, %27 : vector<4x63xf32>
    %249 = arith.addf %245, %248 : vector<4x63xf32>
    %250 = vector.extract_strided_slice %18 {offsets = [6, 3], sizes = [1, 1], strides = [1, 1]} : vector<16x4xf32> to vector<1x1xf32>
    %251 = vector.broadcast %250 : vector<1x1xf32> to vector<4x63xf32>
    %252 = arith.mulf %251, %28 : vector<4x63xf32>
    %253 = arith.addf %249, %252 : vector<4x63xf32>
    %254 = vector.extract_strided_slice %18 {offsets = [7, 3], sizes = [1, 1], strides = [1, 1]} : vector<16x4xf32> to vector<1x1xf32>
    %255 = vector.broadcast %254 : vector<1x1xf32> to vector<4x63xf32>
    %256 = arith.mulf %255, %29 : vector<4x63xf32>
    %257 = arith.addf %253, %256 : vector<4x63xf32>
    %258 = vector.extract_strided_slice %18 {offsets = [8, 3], sizes = [1, 1], strides = [1, 1]} : vector<16x4xf32> to vector<1x1xf32>
    %259 = vector.broadcast %258 : vector<1x1xf32> to vector<4x63xf32>
    %260 = arith.mulf %259, %30 : vector<4x63xf32>
    %261 = arith.addf %257, %260 : vector<4x63xf32>
    %262 = vector.extract_strided_slice %18 {offsets = [9, 3], sizes = [1, 1], strides = [1, 1]} : vector<16x4xf32> to vector<1x1xf32>
    %263 = vector.broadcast %262 : vector<1x1xf32> to vector<4x63xf32>
    %264 = arith.mulf %263, %31 : vector<4x63xf32>
    %265 = arith.addf %261, %264 : vector<4x63xf32>
    %266 = vector.extract_strided_slice %18 {offsets = [10, 3], sizes = [1, 1], strides = [1, 1]} : vector<16x4xf32> to vector<1x1xf32>
    %267 = vector.broadcast %266 : vector<1x1xf32> to vector<4x63xf32>
    %268 = arith.mulf %267, %32 : vector<4x63xf32>
    %269 = arith.addf %265, %268 : vector<4x63xf32>
    %270 = vector.extract_strided_slice %18 {offsets = [11, 3], sizes = [1, 1], strides = [1, 1]} : vector<16x4xf32> to vector<1x1xf32>
    %271 = vector.broadcast %270 : vector<1x1xf32> to vector<4x63xf32>
    %272 = arith.mulf %271, %33 : vector<4x63xf32>
    %273 = arith.addf %269, %272 : vector<4x63xf32>
    %274 = vector.extract_strided_slice %18 {offsets = [12, 3], sizes = [1, 1], strides = [1, 1]} : vector<16x4xf32> to vector<1x1xf32>
    %275 = vector.broadcast %274 : vector<1x1xf32> to vector<4x63xf32>
    %276 = arith.mulf %275, %34 : vector<4x63xf32>
    %277 = arith.addf %273, %276 : vector<4x63xf32>
    %278 = vector.extract_strided_slice %18 {offsets = [13, 3], sizes = [1, 1], strides = [1, 1]} : vector<16x4xf32> to vector<1x1xf32>
    %279 = vector.broadcast %278 : vector<1x1xf32> to vector<4x63xf32>
    %280 = arith.mulf %279, %35 : vector<4x63xf32>
    %281 = arith.addf %277, %280 : vector<4x63xf32>
    %282 = vector.extract_strided_slice %18 {offsets = [14, 3], sizes = [1, 1], strides = [1, 1]} : vector<16x4xf32> to vector<1x1xf32>
    %283 = vector.broadcast %282 : vector<1x1xf32> to vector<4x63xf32>
    %284 = arith.mulf %283, %36 : vector<4x63xf32>
    %285 = arith.addf %281, %284 : vector<4x63xf32>
    %286 = vector.extract_strided_slice %18 {offsets = [15, 3], sizes = [1, 1], strides = [1, 1]} : vector<16x4xf32> to vector<1x1xf32>
    %287 = vector.broadcast %286 : vector<1x1xf32> to vector<4x63xf32>
    %288 = arith.mulf %287, %37 : vector<4x63xf32>
    %289 = arith.addf %285, %288 : vector<4x63xf32>
    %290 = tpu.concatenate %100, %163, %226, %289 in 1 : vector<4x63xf32>, vector<4x63xf32>, vector<4x63xf32>, vector<4x63xf32> -> vector<4x252xf32>
    %c0_6 = arith.constant 0 : index
    %c0_7 = arith.constant 0 : index
    %291 = vector.load %arg3[%c0_6, %c0_7] : memref<4x252xf32, #tpu.memory_space<vmem>>, vector<4x252xf32>
    tpu.vector_store %arg3[%c0_6, %c0_7], %290 {strides = array<i32>} : memref<4x252xf32, #tpu.memory_space<vmem>>, vector<4x252xf32>,
    return
  }
}

</mosaic_0001>

<bundles_post_ra>
// kernel: cos.7
= control target key start
LH: loop header
LB: loop body
LE: loop exit
PB: predicated region body
PF: predicated region fallthrough
CT: control target
= control target key end

     0   :  { %v125_v12 = vmov 683565275   ;;  %v126_v14 = vmov 2475754826   ;;  %v127_v16 = vmov 2131351028   ;;  %s168_s0 = inlined_call_operand.vmem [shape: f32[1,4], index: 0, kind: input, shape index: {}]   ;;  %s169_s1 = inlined_call_operand.vmem [shape: f32[1,4], index: 1, kind: output, shape index: {}]  }
   0x1   :  { %v144_v0 = vld [vmem:[%s168_s0] sm:$0x1]  ;;  %v128_v18 = vmov 2102212464   ;;  %v129_v20 = vmov 920167782  }
   0x2   :  { %v6_v1 = vand.u32 2139095040, %v144_v0  ;;  %v3_v3 = vand.u32 2147483647, %v144_v0  ;;  %v130_v27 = vmov 1326507024   ;;  %vm5_vm7 = vcmp.lt.s32.totalorder %v144_v0, 0 }
   0x3   :  { %vm95_vm12 = vweird.f32 %v144_v0 }
   0x4   :  { %v7_v2 = vshrl.u32 %v6_v1, 23  ;;  %v10_v6 = vand.u32 8388607, %v3_v3  ;;  %vm4_vm8 = vcmp.le.f32.partialorder %v3_v3, 0.7853982 }
   0x6   :  { %v107_v4 = vadd.s32 4294967169, %v7_v2  ;;  %v11_v9 = vor.u32 8388608, %v10_v6 }
   0x8   :  { %v13_v5 = vadd.s32 1, %v107_v4  ;;  %v51_v29 = vshll.u32 %v11_v9, 8 }
   0xa   :  { %vm14_vm0 = vcmp.gt.s32.totalorder %v13_v5, 0 }
   0xb   :  { %v15_v7 = vsel %vm14_vm0, %v13_v5, 0 }
   0xc   :  { %v17_v8 = vand.u32 31, %v15_v7  ;;  %v16_v10 = vshrl.u32 %v15_v7, 5 }
   0xe   :  { %v18_v11 = vsub.s32 32, %v17_v8  ;;  %v20_v13 = vshll.u32 %v125_v12, %v17_v8  ;;  %v23_v15 = vshll.u32 %v126_v14, %v17_v8  ;;  %v26_v17 = vshll.u32 %v127_v16, %v17_v8 }
   0xf   :  { %v29_v19 = vshll.u32 %v128_v18, %v17_v8  ;;  %v32_v21 = vshll.u32 %v129_v20, %v17_v8  ;;  %vm35_vm1 = vcmp.lt.s32.totalorder %v16_v10, 1  ;;  %vm38_vm2 = vcmp.lt.s32.totalorder %v16_v10, 4 }
  0x10   :  { %v19_v22 = vshrl.u32 %v125_v12, %v18_v11  ;;  %v21_v23 = vshrl.u32 %v126_v14, %v18_v11  ;;  %v24_v24 = vshrl.u32 %v127_v16, %v18_v11  ;;  %v27_v25 = vshrl.u32 %v128_v18, %v18_v11 }
  0x11   :  { %v30_v26 = vshrl.u32 %v129_v20, %v18_v11  ;;  %v33_v28 = vshrl.u32 %v130_v27, %v18_v11  ;;  %vm36_vm3 = vcmp.lt.s32.totalorder %v16_v10, 2  ;;  %vm37_vm4 = vcmp.lt.s32.totalorder %v16_v10, 3 }
  0x12   :  { %v22_v30 = vor.u32 %v21_v23, %v20_v13  ;;  %v25_v31 = vor.u32 %v24_v24, %v23_v15  ;;  %v28_v32 = vor.u32 %v27_v25, %v26_v17 }
  0x13   :  { %v31_v33 = vor.u32 %v30_v26, %v29_v19  ;;  %v34_v34 = vor.u32 %v33_v28, %v32_v21 }
  0x14   :  { %v39_v35 = vsel %vm35_vm1, %v19_v22, %v22_v30  ;;  %v40_v36 = vsel %vm38_vm2, %v28_v32, 2102212464  ;;  %v43_v37 = vsel %vm35_vm1, %v22_v30, %v25_v31  ;;  %v47_v38 = vsel %vm35_vm1, %v25_v31, %v28_v32 }
  0x15   :  { %v41_v39 = vsel %vm37_vm4, %v25_v31, %v40_v36  ;;  %v44_v40 = vsel %vm38_vm2, %v31_v33, 920167782  ;;  %v48_v41 = vsel %vm38_vm2, %v34_v34, 1326507024 }
  0x16   :  { %v45_v42 = vsel %vm37_vm4, %v28_v32, %v44_v40  ;;  %v49_v43 = vsel %vm37_vm4, %v31_v33, %v48_v41  ;;  %v42_v44 = vsel %vm36_vm3, %v39_v35, %v41_v39 }
  0x17   :  { %v46_v45 = vsel %vm36_vm3, %v43_v37, %v45_v42  ;;  %v50_v46 = vsel %vm36_vm3, %v47_v38, %v49_v43  ;;  %v58_v51 = vmul.u32 %v51_v29, %v42_v44 }
  0x18   :  { %v150_v47 = vmul.u32.u64.low %v51_v29, %v50_v46  ;;  %v151_v48 = vmul.u32.u64.high %v51_v29, %v50_v46, %v150_v47  ;;  %v153_v49 = vmul.u32.u64.low %v51_v29, %v46_v45  ;;  %v154_v50 = vmul.u32.u64.high %v51_v29, %v46_v45, %v153_v49 }
  0x1a   :  { %vm60_vm5 = vc.u32 %v151_v48, %v153_v49  ;;  %v61_v52 = vadd.s32 1, %v154_v50  ;;  %v59_v63 = vadd.s32 %v153_v49, %v151_v48 }
  0x1c   :  { %v62_v53 = vsel %vm60_vm5, %v61_v52, %v154_v50 }
  0x1d   :  { %v63_v54 = vadd.s32 %v62_v53, %v58_v51 }
  0x1f   :  { %v64_v55 = vadd.s32 536870912, %v63_v54 }
  0x21   :  { %v65_v56 = vshrl.u32 %v64_v55, 30 }
  0x23   :  { %v66_v57 = vshll.u32 %v65_v56, 30  ;;  %v89_v15 = vsub.s32 4, %v65_v56 }
  0x25   :  { %v67_v58 = vsub.s32 %v63_v54, %v66_v57  ;;  %v90_v17 = vsel %vm5_vm7, %v89_v15, %v65_v56 }
  0x26   :  { %v92_v18 = vsel %vm4_vm8, 0, %v90_v17 }
  0x27   :  { %v69_v59 = vsub.s32 0, %v67_v58  ;;  %v96_v19 = vand.u32 3, %v92_v18 }
  0x29   :  { %v108_v60 = vmin.u32 %v69_v59, %v67_v58  ;;  %vm101_vm9 = vcmp.eq.s32.totalorder %v96_v19, 2  ;;  %vm98_vm10 = vcmp.eq.s32.totalorder %v96_v19, 0  ;;  %vm97_vm11 = vcmp.lt.s32.totalorder %v96_v19, 2 }
  0x2b   :  { %v71_v61 = vclz %v108_v60 }
  0x2d   :  { %v109_v62 = vadd.s32 4294967294, %v71_v61 }
  0x2f   :  { %vm110_vm6 = vcmp.lt.s32.totalorder %v109_v62, 0 }
  0x30   :  { %v74_v1 = vsel %vm110_vm6, 0, %v109_v62 }
  0x31   :  { %v75_v2 = vsub.s32 32, %v74_v1  ;;  %v76_v4 = vshll.u32 %v67_v58, %v74_v1  ;;  %v79_v5 = vsub.s32 4294967266, %v74_v1 }
  0x33   :  { %v77_v6 = vshrl.u32 %v59_v63, %v75_v2  ;;  %v80_v7 = vadd.s32 127, %v79_v5 }
  0x35   :  { %v78_v8 = vor.u32 %v77_v6, %v76_v4  ;;  %v81_v9 = vshll.u32 %v80_v7, 23 }
  0x37   :  { %v82_v10 = vor.u32 4788187, %v81_v9  ;;  %v85_v11 = vcvt.s32.f32 %v78_v8 }
  0x39   :  { %v83_v12 = vand.u32 2147483647, %v82_v10 }
  0x3b   :  { %v86_v13 = vmul.f32 %v85_v11, %v83_v12 }
  0x3d   :  { %v87_v3 = vxor.u32 2147483648, %v86_v13 }
  0x3f   :  { %v88_v14 = vsel %vm5_vm7, %v87_v3, %v86_v13 }
  0x40   :  { %v91_v16 = vsel %vm4_vm8, %v144_v0, %v88_v14 }
  0x41   :  { %121 = vcosq.f32 %v91_v16 }
  0x42   :  { %123 = vsinq.f32 %v91_v16 }
  0x4e   :  { %v122_v20 = vpop.eup %121 }
  0x4f   :  { %v124_v21 = vpop.eup %123  ;;  %v102_v22 = vxor.u32 2147483648, %v122_v20 }
  0x50   :  { %v99_v23 = vxor.u32 2147483648, %v124_v21 }
  0x51   :  { %v103_v0 = vsel %vm101_vm9, %v102_v22, %v124_v21 }
  0x52   :  { %v100_v24 = vsel %vm98_vm10, %v122_v20, %v99_v23 }
  0x53   :  { %v104_v25 = vsel %vm97_vm11, %v100_v24, %v103_v0 }
  0x54   :  { %v105_v26 = vsel %vm95_vm12, nan, %v104_v25 }
  0x55   :  { %106 = vst [vmem:[%s169_s1] sm:$0x1] %v105_v26 }

// kernel: lwk_forward.1
= control target key start
LH: loop header
LB: loop body
LE: loop exit
PB: predicated region body
PF: predicated region fallthrough
CT: control target
= control target key end

     0   :  { %v919_v0 = vmov 0   ;;  %v920_v3 = vmov 1   ;;  %v30_v7 = vlaneseq  ;;  %s1403_s18 = smov 125   ;;  %s924_s21 = smov 7   ;;  %vm63_vm0 = vcmask 56320   ;;  %s1399_s1 = inlined_call_operand.vmem [shape: f32[16,2], index: 1, kind: input, shape index: {}]   ;;  %s1400_s0 = inlined_call_operand.vmem [shape: f32[3,4], index: 0, kind: input, shape index: {}]   ;;  %s1401_s2 = inlined_call_operand.vmem [shape: f32[4,64], index: 2, kind: input, shape index: {}]   ;;  %s1402_s3 = inlined_call_operand.vmem [shape: f32[4,252], index: 3, kind: output, shape index: {}]  }
   0x1   :  { %1409 = sst [smem:[#allocation5_spill]] %s1402_s3  ;;  %913 = vset.pattern.permute.xlu0 %v919_v0  ;;  %915 = vset.pattern.permute.xlu1 %v919_v0  ;;  %v15_v1 = vld [vmem:[%s1399_s1] sm:$0xff]  ;;  %v16_v2 = vld [vmem:[%s1399_s1 + $0x8] sm:$0xff]  ;;  %s1405_s1 = smov 126   ;;  %vm65_vm1 = vcmask 580608   ;;  %vm747_vm2 = vcmask 515072  }
   0x2   :  { %22 = vperm.xlu0 %913, %v15_v1   ;;  %27 = vperm.xlu1 %915, %v16_v2   ;;  %v14_v4 = vld [vmem:[%s1400_s0] sm:$0x7]  ;;  %v31_v8 = vshrl.u32 %v30_v7, 7  ;;  %s1407_s0 = smov 127   ;;  %vm749_vm3 = vcmask 1031168   ;;  %vm751_vm4 = vcmask 498688  }
   0x3   :  { %v17_v5 = vmul.f32 0.03001351, %v14_v4  ;;  %v58_v42 = vld [vmem:[%s1401_s2] sm:$0xf]  ;;  %vm757_vm5 = vcmask 1043456   ;;  %vm758_vm6 = vcmask 1014788  }
   0x4   :  { %v32_v9 = vsub.s32 2, %v31_v8  ;;  %v46_v10 = vsub.s32 1, %v31_v8  ;;  %v54_v13 = vsub.s32 0, %v31_v8  ;;  %vm759_vm7 = vmor %vm758_vm6, %vm757_vm5 }
   0x5   :  { %v18_v6 = vmul.f32 1.442695, %v17_v5 }
   0x6   :  { %914 = vset.pattern.permute.xlu0 %v920_v3  ;;  %916 = vset.pattern.permute.xlu1 %v920_v3  ;;  %v33_v15 = vrot.slane %v14_v4, %v32_v9  ;;  %v47_v16 = vrot.slane %v14_v4, %v46_v10 }
   0x7   :  { %37 = vperm.xlu0 %914, %v15_v1   ;;  %41 = vperm.xlu1 %916, %v16_v2   ;;  %917 = vpow2.f32 %v18_v6 }
  0x14   :  { %v918_v14 = vpop.eup %917 }
  0x15   :  { %v55_v18 = vrot.slane %v918_v14, %v54_v13 }
  0x7d   :  { %v23_v11 = vpop.permute.xlu0 %22  ;;  %v28_v12 = vpop.permute.xlu1 %27 }
  0x7e   :  { %v34_v20 = vmul.f32 %v33_v15, %v23_v11  ;;  %v35_v21 = vmul.f32 %v33_v15, %v28_v12 }
  0x82   :  { %v38_v17 = vpop.permute.xlu0 %37  ;;  %v42_v19 = vpop.permute.xlu1 %41 }
  0x83   :  { %v48_v22 = vmul.f32 %v47_v16, %v38_v17  ;;  %v49_v23 = vmul.f32 %v47_v16, %v42_v19 }
  0x85   :  { %v50_v24 = vadd.f32 %v48_v22, %v34_v20  ;;  %v51_v26 = vadd.f32 %v49_v23, %v35_v21 }
  0x87   :  { %v56_v25 = vmul.f32 %v55_v18, %v50_v24  ;;  %v977_v31 = vmul.f32 %v55_v18, %v51_v26 }
  0x89   :  { %222 = vrot.lane.b32.xlu1 %v56_v25, %s1407_s0  ;;  %765 = vpush %v56_v25  ;;  %v969_v27 = vrot.slane %v56_v25, 1  ;;  %v971_v28 = vrot.slane %v56_v25, 2  ;;  %v973_v29 = vrot.slane %v56_v25, 3  ;;  %v975_v30 = vrot.slane %v56_v25, 4 }
  0x8a   :  { %v112_v32 = vrot.slane %v56_v25, 5  ;;  %v122_v33 = vrot.slane %v56_v25, 6  ;;  %v132_v34 = vrot.slane %v56_v25, 7  ;;  %v152_v35 = vrot.slane %v977_v31, 1 }
  0x8b   :  { %228 = vrot.lane.b32.xlu0 %v969_v27, %s1407_s0  ;;  %767 = vpush %v969_v27  ;;  %v162_v36 = vrot.slane %v977_v31, 2  ;;  %v172_v37 = vrot.slane %v977_v31, 3  ;;  %v182_v38 = vrot.slane %v977_v31, 4  ;;  %v192_v39 = vrot.slane %v977_v31, 5 }
  0x8c   :  { %769 = vpush %v971_v28  ;;  %v202_v40 = vrot.slane %v977_v31, 6  ;;  %v212_v41 = vrot.slane %v977_v31, 7 }
  0x8d   :  { %771 = vpush %v973_v29  ;;  %305 = vrot.lane.b32.xlu1 %v977_v31, %s1407_s0 }
  0x8e   :  { %773 = vpush %v975_v30 }
  0x8f   :  { %775 = vpush %v112_v32  ;;  %250 = vrot.lane.b32.xlu0 %v973_v29, %s1407_s0 }
  0x90   :  { %777 = vpush %v122_v33 }
  0x91   :  { %779 = vpush %v132_v34  ;;  %393 = vrot.lane.b32.xlu1 %v56_v25, %s1405_s1 }
  0x92   :  { %781 = vpush %v977_v31 }
  0x93   :  { %783 = vpush %v152_v35  ;;  %272 = vrot.lane.b32.xlu0 %v112_v32, %s1407_s0 }
  0x94   :  { %785 = vpush %v162_v36 }
  0x95   :  { %787 = vpush %v172_v37  ;;  %476 = vrot.lane.b32.xlu1 %v977_v31, %s1405_s1 }
  0x96   :  { %789 = vpush %v182_v38 }
  0x97   :  { %791 = vpush %v192_v39  ;;  %294 = vrot.lane.b32.xlu0 %v132_v34, %s1407_s0 }
  0x98   :  { %793 = vpush %v202_v40 }
  0x99   :  { %795 = vpush %v212_v41  ;;  %564 = vrot.lane.b32.xlu1 %v56_v25, %s1403_s18 }
  0x9b   :  { %316 = vrot.lane.b32.xlu0 %v152_v35, %s1407_s0 }
  0x9d   :  { %239 = vrot.lane.b32.xlu1 %v971_v28, %s1407_s0 }
  0x9f   :  { %338 = vrot.lane.b32.xlu0 %v172_v37, %s1407_s0 }
  0xa1   :  { %261 = vrot.lane.b32.xlu1 %v975_v30, %s1407_s0 }
  0xa3   :  { %360 = vrot.lane.b32.xlu0 %v192_v39, %s1407_s0 }
  0xa5   :  { %283 = vrot.lane.b32.xlu1 %v122_v33, %s1407_s0 }
  0xa7   :  { %382 = vrot.lane.b32.xlu0 %v212_v41, %s1407_s0 }
  0xa9   :  { %327 = vrot.lane.b32.xlu1 %v162_v36, %s1407_s0 }
  0xab   :  { %399 = vrot.lane.b32.xlu0 %v969_v27, %s1405_s1 }
  0xad   :  { %349 = vrot.lane.b32.xlu1 %v182_v38, %s1407_s0 }
  0xaf   :  { %421 = vrot.lane.b32.xlu0 %v973_v29, %s1405_s1 }
  0xb1   :  { %371 = vrot.lane.b32.xlu1 %v202_v40, %s1407_s0 }
  0xb3   :  { %443 = vrot.lane.b32.xlu0 %v112_v32, %s1405_s1 }
  0xb5   :  { %410 = vrot.lane.b32.xlu1 %v971_v28, %s1405_s1 }
  0xb7   :  { %465 = vrot.lane.b32.xlu0 %v132_v34, %s1405_s1 }
  0xb9   :  { %432 = vrot.lane.b32.xlu1 %v975_v30, %s1405_s1 }
  0xba   :  { %s1058_s2 = spop %765 }
  0xbb   :  { %487 = vrot.lane.b32.xlu0 %v152_v35, %s1405_s1  ;;  %v69_v26 = vstv %s1058_s2 }
  0xbc   :  { %s1060_s22 = spop %767 }
  0xbd   :  { %454 = vrot.lane.b32.xlu1 %v122_v33, %s1405_s1  ;;  %s1062_s23 = spop %769 }
  0xbe   :  { %s1064_s24 = spop %771 }
  0xbf   :  { %509 = vrot.lane.b32.xlu0 %v172_v37, %s1405_s1  ;;  %s1066_s25 = spop %773 }
  0xc0   :  { %s1068_s26 = spop %775 }
  0xc1   :  { %498 = vrot.lane.b32.xlu1 %v162_v36, %s1405_s1  ;;  %s1070_s27 = spop %777 }
  0xc2   :  { %s1072_s28 = spop %779 }
  0xc3   :  { %531 = vrot.lane.b32.xlu0 %v192_v39, %s1405_s1  ;;  %s1074_s29 = spop %781 }
  0xc4   :  { %s1076_s30 = spop %783 }
  0xc5   :  { %520 = vrot.lane.b32.xlu1 %v182_v38, %s1405_s1  ;;  %s1078_s4 = spop %785 }
  0xc6   :  { %s1080_s5 = spop %787 }
  0xc7   :  { %553 = vrot.lane.b32.xlu0 %v212_v41, %s1405_s1  ;;  %s1082_s6 = spop %789 }
  0xc8   :  { %s1084_s7 = spop %791 }
  0xc9   :  { %542 = vrot.lane.b32.xlu1 %v202_v40, %s1405_s1  ;;  %s1086_s8 = spop %793 }
  0xca   :  { %s1089_s9 = spop %795 }
  0xcb   :  { %570 = vrot.lane.b32.xlu0 %v969_v27, %s1403_s18  ;;  %1410 = sst [smem:[#allocation2_spill]] %s1089_s9  ;;  %v74_v27 = vstv %s1060_s22 }
  0xcd   :  { %581 = vrot.lane.b32.xlu1 %v971_v28, %s1403_s18  ;;  %v84_v28 = vstv %s1062_s23 }
  0xcf   :  { %592 = vrot.lane.b32.xlu0 %v973_v29, %s1403_s18 }
  0xd1   :  { %603 = vrot.lane.b32.xlu1 %v975_v30, %s1403_s18  ;;  %v94_v30 = vstv %s1064_s24 }
  0xd3   :  { %614 = vrot.lane.b32.xlu0 %v112_v32, %s1403_s18  ;;  %v114_v32 = vstv %s1068_s26 }
  0xd5   :  { %625 = vrot.lane.b32.xlu1 %v122_v33, %s1403_s18  ;;  %v124_v33 = vstv %s1070_s27 }
  0xd7   :  { %636 = vrot.lane.b32.xlu0 %v132_v34, %s1403_s18  ;;  %v134_v34 = vstv %s1072_s28  ;;  %s1413_s28 = smov 127  }
  0xd9   :  { %647 = vrot.lane.b32.xlu1 %v977_v31, %s1403_s18  ;;  %v104_v31 = vstv %s1066_s25 }
  0xdb   :  { %658 = vrot.lane.b32.xlu0 %v152_v35, %s1403_s18  ;;  %v144_v35 = vstv %s1074_s29 }
  0xdd   :  { %669 = vrot.lane.b32.xlu1 %v162_v36, %s1403_s18  ;;  %v154_v36 = vstv %s1076_s30  ;;  %s1414_s30 = smov 126  }
  0xdf   :  { %680 = vrot.lane.b32.xlu0 %v172_v37, %s1403_s18 }
  0xe1   :  { %691 = vrot.lane.b32.xlu1 %v182_v38, %s1403_s18  ;;  %v164_v38 = vstv %s1078_s4 }
  0xe3   :  { %702 = vrot.lane.b32.xlu0 %v192_v39, %s1403_s18  ;;  %v174_v39 = vstv %s1080_s5 }
  0xe5   :  { %713 = vrot.lane.b32.xlu1 %v202_v40, %s1403_s18  ;;  %v184_v40 = vstv %s1082_s6 }
  0xe7   :  { %724 = vrot.lane.b32.xlu0 %v212_v41, %s1403_s18 }
  0xe9   :  { %60 = vrot.lane.b32.xlu1 %v58_v42, %s924_s21  ;;  %v194_v42 = vstv %s1084_s7 }
  0xfb   :  { %v223_v43 = vpop.permute.xlu1 %222 }
  0xfc   :  { %797 = vpush %v223_v43  ;;  %v204_v43 = vstv %s1086_s8 }
  0xfd   :  { %v229_v44 = vpop.permute.xlu0 %228 }
  0xfe   :  { %799 = vpush %v229_v44 }
  0xff   :  { %v306_v45 = vpop.permute.xlu1 %305 }
 0x101   :  { %v251_v46 = vpop.permute.xlu0 %250 }
 0x103   :  { %v394_v47 = vpop.permute.xlu1 %393 }
 0x105   :  { %v273_v48 = vpop.permute.xlu0 %272 }
 0x107   :  { %v477_v49 = vpop.permute.xlu1 %476 }
 0x109   :  { %v295_v50 = vpop.permute.xlu0 %294 }
 0x10b   :  { %v1056_v51 = vpop.permute.xlu1 %564 }
 0x10d   :  { %v317_v52 = vpop.permute.xlu0 %316 }
 0x10f   :  { %v240_v53 = vpop.permute.xlu1 %239 }
 0x110   :  { %801 = vpush %v240_v53 }
 0x111   :  { %803 = vpush %v251_v46  ;;  %v339_v54 = vpop.permute.xlu0 %338 }
 0x113   :  { %v262_v55 = vpop.permute.xlu1 %261 }
 0x114   :  { %805 = vpush %v262_v55 }
 0x115   :  { %807 = vpush %v273_v48  ;;  %v361_v56 = vpop.permute.xlu0 %360 }
 0x117   :  { %v284_v57 = vpop.permute.xlu1 %283 }
 0x118   :  { %809 = vpush %v284_v57 }
 0x119   :  { %811 = vpush %v295_v50  ;;  %v383_v58 = vpop.permute.xlu0 %382 }
 0x11a   :  { %813 = vpush %v306_v45 }
 0x11b   :  { %815 = vpush %v317_v52  ;;  %v328_v59 = vpop.permute.xlu1 %327 }
 0x11c   :  { %817 = vpush %v328_v59 }
 0x11d   :  { %819 = vpush %v339_v54  ;;  %v400_v60 = vpop.permute.xlu0 %399 }
 0x11f   :  { %v350_v61 = vpop.permute.xlu1 %349 }
 0x120   :  { %821 = vpush %v350_v61 }
 0x121   :  { %823 = vpush %v361_v56  ;;  %v422_v62 = vpop.permute.xlu0 %421 }
 0x123   :  { %v372_v63 = vpop.permute.xlu1 %371 }
 0x124   :  { %825 = vpush %v372_v63 }
 0x125   :  { %827 = vpush %v383_v58  ;;  %v444_v0 = vpop.permute.xlu0 %443 }
 0x126   :  { %829 = vpush %v394_v47 }
 0x127   :  { %831 = vpush %v400_v60  ;;  %v411_v1 = vpop.permute.xlu1 %410 }
 0x128   :  { %833 = vpush %v411_v1 }
 0x129   :  { %835 = vpush %v422_v62  ;;  %v466_v2 = vpop.permute.xlu0 %465 }
 0x12b   :  { %v433_v3 = vpop.permute.xlu1 %432 }
 0x12c   :  { %837 = vpush %v433_v3 }
 0x12d   :  { %839 = vpush %v444_v0  ;;  %v488_v4 = vpop.permute.xlu0 %487  ;;  %s1091_s10 = spop %797 }
 0x12e   :  { %v225_v44 = vstv %s1091_s10 }
 0x12f   :  { %v455_v5 = vpop.permute.xlu1 %454  ;;  %s1093_s11 = spop %799 }
 0x130   :  { %841 = vpush %v455_v5  ;;  %v231_v58 = vstv %s1093_s11  ;;  %s1415_s11 = smov 125  }
 0x131   :  { %843 = vpush %v466_v2  ;;  %v510_v6 = vpop.permute.xlu0 %509 }
 0x132   :  { %845 = vpush %v477_v49 }
 0x133   :  { %847 = vpush %v488_v4  ;;  %v499_v7 = vpop.permute.xlu1 %498 }
 0x134   :  { %849 = vpush %v499_v7 }
 0x135   :  { %851 = vpush %v510_v6  ;;  %v532_v8 = vpop.permute.xlu0 %531 }
 0x137   :  { %v521_v9 = vpop.permute.xlu1 %520 }
 0x138   :  { %853 = vpush %v521_v9 }
 0x139   :  { %855 = vpush %v532_v8  ;;  %v554_v10 = vpop.permute.xlu0 %553 }
 0x13b   :  { %v543_v11 = vpop.permute.xlu1 %542 }
 0x13c   :  { %857 = vpush %v543_v11 }
 0x13d   :  { %859 = vpush %v554_v10  ;;  %v571_v12 = vpop.permute.xlu0 %570 }
 0x13e   :  { %861 = vpush %v1056_v51 }
 0x13f   :  { %863 = vpush %v571_v12  ;;  %v582_v13 = vpop.permute.xlu1 %581 }
 0x140   :  { %865 = vpush %v582_v13 }
 0x141   :  { %v593_v14 = vpop.permute.xlu0 %592  ;;  %s1095_s12 = spop %801 }
 0x142   :  { %867 = vpush %v593_v14  ;;  %s1097_s13 = spop %803  ;;  %v242_v14 = vstv %s1095_s12  ;;  %s925_s12 = smov 124  }
 0x143   :  { %v604_v15 = vpop.permute.xlu1 %603 }
 0x144   :  { %869 = vpush %v604_v15 }
 0x145   :  { %v615_v16 = vpop.permute.xlu0 %614  ;;  %s1099_s14 = spop %805 }
 0x146   :  { %871 = vpush %v615_v16  ;;  %s1101_s15 = spop %807 }
 0x147   :  { %v626_v17 = vpop.permute.xlu1 %625 }
 0x148   :  { %873 = vpush %v626_v17 }
 0x149   :  { %v637_v18 = vpop.permute.xlu0 %636  ;;  %s1103_s16 = spop %809 }
 0x14a   :  { %s1105_s17 = spop %811  ;;  %875 = vpush %v637_v18 }
 0x14b   :  { %v648_v19 = vpop.permute.xlu1 %647  ;;  %s1107_s19 = spop %813 }
 0x14c   :  { %877 = vpush %v648_v19  ;;  %s1109_s20 = spop %815 }
 0x14d   :  { %v659_v20 = vpop.permute.xlu0 %658  ;;  %1411 = sst [smem:[#allocation3_spill]] %s1109_s20  ;;  %s1111_s21 = spop %817 }
 0x14e   :  { %879 = vpush %v659_v20  ;;  %1412 = sst [smem:[#allocation4_spill]] %s1111_s21  ;;  %s1113_s18 = spop %819 }
 0x14f   :  { %v670_v21 = vpop.permute.xlu1 %669  ;;  %v341_v0 = vstv %s1113_s18 }
 0x150   :  { %881 = vpush %v670_v21 }
 0x151   :  { %v681_v22 = vpop.permute.xlu0 %680  ;;  %s1115_s1 = spop %821 }
 0x152   :  { %883 = vpush %v681_v22  ;;  %s1117_s0 = spop %823  ;;  %v352_v1 = vstv %s1115_s1 }
 0x153   :  { %v692_v23 = vpop.permute.xlu1 %691  ;;  %v363_v2 = vstv %s1117_s0 }
 0x154   :  { %885 = vpush %v692_v23 }
 0x155   :  { %v703_v24 = vpop.permute.xlu0 %702  ;;  %s1119_s3 = spop %825 }
 0x156   :  { %s1121_s9 = spop %827  ;;  %887 = vpush %v703_v24  ;;  %v374_v3 = vstv %s1119_s3 }
 0x157   :  { %v714_v25 = vpop.permute.xlu1 %713  ;;  %s1123_s21 = spop %829  ;;  %v385_v4 = vstv %s1121_s9 }
 0x158   :  { %889 = vpush %v714_v25  ;;  %s1131_s20 = spop %831  ;;  %v396_v5 = vstv %s1123_s21  ;;  %s927_s21 = smov 122  }
 0x159   :  { %v725_v29 = vpop.permute.xlu0 %724  ;;  %s1137_s2 = spop %833  ;;  %v402_v6 = vstv %s1131_s20  ;;  %s926_s20 = smov 123  }
 0x15a   :  { %891 = vpush %v725_v29  ;;  %s1146_s22 = spop %835 }
 0x15b   :  { %v61_v37 = vpop.permute.xlu1 %60 }
 0x15c   :  { %v64_v41 = vsel %vm63_vm0, 0.0, %v61_v37 }
 0x15d   :  { %v1148_v45 = vsel %vm65_vm1, %v64_v41, 0.0  ;;  %s1162_s23 = spop %837 }
 0x15e   :  { %v1151_v46 = vmul.f32 %v69_v26, %v1148_v45  ;;  %v1154_v47 = vmul.f32 %v74_v27, %v1148_v45  ;;  %v1157_v48 = vmul.f32 %v84_v28, %v1148_v45  ;;  %v1160_v49 = vmul.f32 %v94_v30, %v1148_v45  ;;  %s1188_s24 = spop %839 }
 0x15f   :  { %v1165_v50 = vmul.f32 %v104_v31, %v1148_v45  ;;  %v1168_v51 = vmul.f32 %v114_v32, %v1148_v45  ;;  %v1171_v52 = vmul.f32 %v124_v33, %v1148_v45  ;;  %v1174_v53 = vmul.f32 %v134_v34, %v1148_v45 }
 0x160   :  { %v1177_v54 = vmul.f32 %v144_v35, %v1148_v45  ;;  %v1180_v55 = vmul.f32 %v154_v36, %v1148_v45  ;;  %v1183_v56 = vmul.f32 %v164_v38, %v1148_v45  ;;  %v1186_v57 = vmul.f32 %v174_v39, %v1148_v45 }
 0x161   :  { %v1192_v59 = vmul.f32 %v184_v40, %v1148_v45  ;;  %v1195_v60 = vmul.f32 %v194_v42, %v1148_v45  ;;  %v1198_v61 = vmul.f32 %v204_v43, %v1148_v45  ;;  %s1200_s25 = spop %841  ;;  %v1203_v62 = vmul.f32 %v225_v44, %v1148_v45 }
 0x162   :  { %v233_v63 = vmul.f32 %v231_v58, %v1148_v45  ;;  %s1206_s26 = spop %843  ;;  %v1218_v7 = vmul.f32 %v341_v0, %v1148_v45  ;;  %v1222_v8 = vmul.f32 %v352_v1, %v1148_v45  ;;  %v1225_v9 = vmul.f32 %v363_v2, %v1148_v45 }
 0x163   :  { %s1212_s27 = spop %845  ;;  %v1228_v10 = vmul.f32 %v374_v3, %v1148_v45  ;;  %v1231_v11 = vmul.f32 %v385_v4, %v1148_v45  ;;  %v1236_v12 = vmul.f32 %v396_v5, %v1148_v45  ;;  %v404_v13 = vmul.f32 %v402_v6, %v1148_v45 }
 0x164   :  { %235 = vrot.lane.b32.xlu0 %v233_v63, %s1413_s28  ;;  %s1233_s3 = spop %847  ;;  %v244_v15 = vmul.f32 %v242_v14, %v1148_v45  ;;  %v413_v30 = vstv %s1137_s2  ;;  %v424_v31 = vstv %s1146_s22  ;;  %v253_v34 = vstv %s1097_s13  ;;  %s928_s2 = smov 121  }
 0x165   :  { %s1239_s0 = spop %849  ;;  %406 = vrot.lane.b32.xlu1 %v404_v13, %s1413_s28  ;;  %v415_v32 = vmul.f32 %v413_v30, %v1148_v45  ;;  %v426_v33 = vmul.f32 %v424_v31, %v1148_v45  ;;  %v264_v35 = vstv %s1099_s14  ;;  %v255_v36 = vmul.f32 %v253_v34, %v1148_v45  ;;  %s1416_s22 = sld [smem:[#allocation3_spill]] }
 0x166   :  { %s1242_s1 = spop %851  ;;  %v266_v37 = vmul.f32 %v264_v35, %v1148_v45  ;;  %v435_v41 = vstv %s1162_s23  ;;  %v446_v43 = vstv %s1188_s24  ;;  %v275_v63 = vstv %s1101_s15  ;;  %s929_s23 = smov 120  }
 0x167   :  { %v437_v44 = vmul.f32 %v435_v41, %v1148_v45  ;;  %v448_v58 = vmul.f32 %v446_v43, %v1148_v45  ;;  %v286_v0 = vstv %s1103_s16  ;;  %v277_v1 = vmul.f32 %v275_v63, %v1148_v45  ;;  %s1417_s24 = sld [smem:[#allocation4_spill]] }
 0x168   :  { %v288_v2 = vmul.f32 %v286_v0, %v1148_v45  ;;  %v457_v6 = vstv %s1200_s25  ;;  %v468_v14 = vstv %s1206_s26  ;;  %v490_v31 = vstv %s1233_s3  ;;  %s930_s25 = smov 119   ;;  %s931_s26 = smov 118  }
 0x169   :  { %s854_s18 = spop %853  ;;  %246 = vrot.lane.b32.xlu1 %v244_v15, %s1414_s30  ;;  %v459_v15 = vmul.f32 %v457_v6, %v1148_v45  ;;  %v501_v41 = vstv %s1239_s0  ;;  %v512_v43 = vstv %s1242_s1  ;;  %s933_s0 = smov 116  }
 0x16a   :  { %s856_s29 = spop %855  ;;  %v523_v16 = vstv %s854_s18  ;;  %s932_s18 = smov 117  }
 0x16b   :  { %v534_v17 = vstv %s856_s29  ;;  %v1248_v18 = vmul.f32 %v523_v16, %v1148_v45  ;;  %v470_v16 = vmul.f32 %v468_v14, %v1148_v45  ;;  %v319_v34 = vstv %s1416_s22 }
 0x16c   :  { %v1251_v19 = vmul.f32 %v534_v17, %v1148_v45  ;;  %v297_v17 = vstv %s1105_s17 }
 0x16d   :  { %s858_s4 = spop %857  ;;  %v330_v35 = vstv %s1417_s24 }
 0x16e   :  { %v545_v20 = vstv %s858_s4  ;;  %s860_s5 = spop %859  ;;  %s934_s4 = smov 115  }
 0x16f   :  { %v1254_v21 = vmul.f32 %v545_v20, %v1148_v45  ;;  %v556_v22 = vstv %s860_s5  ;;  %s862_s6 = spop %861  ;;  %v308_v20 = vstv %s1107_s19  ;;  %s935_s5 = smov 114  }
 0x170   :  { %v1257_v23 = vmul.f32 %v556_v22, %v1148_v45  ;;  %v567_v24 = vstv %s862_s6  ;;  %s864_s7 = spop %863  ;;  %v299_v22 = vmul.f32 %v297_v17, %v1148_v45 }
 0x171   :  { %v1260_v25 = vmul.f32 %v567_v24, %v1148_v45  ;;  %v573_v26 = vstv %s864_s7  ;;  %s866_s8 = spop %865  ;;  %v310_v24 = vmul.f32 %v308_v20, %v1148_v45  ;;  %s936_s7 = smov 113  }
 0x172   :  { %v575_v27 = vmul.f32 %v573_v26, %v1148_v45  ;;  %v584_v28 = vstv %s866_s8  ;;  %s1418_s8 = sld [smem:[#allocation2_spill]] }
 0x173   :  { %v586_v29 = vmul.f32 %v584_v28, %v1148_v45  ;;  %s868_s9 = spop %867 }
 0x174   :  { %577 = vrot.lane.b32.xlu0 %v575_v27, %s1413_s28  ;;  %v595_v38 = vstv %s868_s9  ;;  %s938_s9 = smov 61  }
 0x175   :  { %588 = vrot.lane.b32.xlu1 %v586_v29, %s1414_s30  ;;  %s870_s10 = spop %869  ;;  %v597_v40 = vmul.f32 %v595_v38, %v1148_v45  ;;  %v479_v29 = vstv %s1212_s27 }
 0x176   :  { %v606_v39 = vstv %s870_s10 }
 0x177   :  { %v608_v42 = vmul.f32 %v606_v39, %v1148_v45  ;;  %s872_s13 = spop %871 }
 0x178   :  { %417 = vrot.lane.b32.xlu0 %v415_v32, %s1414_s30  ;;  %v617_v3 = vstv %s872_s13  ;;  %v481_v32 = vmul.f32 %v479_v29, %v1148_v45 }
 0x179   :  { %428 = vrot.lane.b32.xlu1 %v426_v33, %s1415_s11  ;;  %s874_s14 = spop %873  ;;  %v619_v5 = vmul.f32 %v617_v3, %v1148_v45  ;;  %v492_v33 = vmul.f32 %v490_v31, %v1148_v45 }
 0x17a   :  { %v628_v4 = vstv %s874_s14 }
 0x17b   :  { %v630_v13 = vmul.f32 %v628_v4, %v1148_v45  ;;  %s876_s15 = spop %875 }
 0x17c   :  { %257 = vrot.lane.b32.xlu0 %v255_v36, %s1415_s11  ;;  %v639_v26 = vstv %s876_s15  ;;  %v321_v36 = vmul.f32 %v319_v34, %v1148_v45 }
 0x17d   :  { %268 = vrot.lane.b32.xlu1 %v266_v37, %s925_s12  ;;  %s878_s16 = spop %877  ;;  %v641_v28 = vmul.f32 %v639_v26, %v1148_v45  ;;  %v332_v37 = vmul.f32 %v330_v35, %v1148_v45 }
 0x17e   :  { %v650_v27 = vstv %s878_s16 }
 0x17f   :  { %v652_v30 = vmul.f32 %v650_v27, %v1148_v45  ;;  %s880_s17 = spop %879 }
 0x180   :  { %599 = vrot.lane.b32.xlu0 %v597_v40, %s1415_s11  ;;  %v661_v38 = vstv %s880_s17 }
 0x181   :  { %610 = vrot.lane.b32.xlu1 %v608_v42, %s925_s12  ;;  %s882_s19 = spop %881  ;;  %v663_v40 = vmul.f32 %v661_v38, %v1148_v45 }
 0x182   :  { %v672_v39 = vstv %s882_s19 }
 0x183   :  { %v674_v42 = vmul.f32 %v672_v39, %v1148_v45  ;;  %s884_s27 = spop %883 }
 0x184   :  { %439 = vrot.lane.b32.xlu0 %v437_v44, %s925_s12  ;;  %v503_v44 = vmul.f32 %v501_v41, %v1148_v45  ;;  %v683_v63 = vstv %s884_s27 }
 0x185   :  { %450 = vrot.lane.b32.xlu1 %v448_v58, %s926_s20  ;;  %v514_v58 = vmul.f32 %v512_v43, %v1148_v45  ;;  %s886_s3 = spop %885 }
 0x186   :  { %v694_v0 = vstv %s886_s3 }
 0x187   :  { %s888_s1 = spop %887 }
 0x188   :  { %279 = vrot.lane.b32.xlu0 %v277_v1, %s926_s20  ;;  %v685_v1 = vmul.f32 %v683_v63, %v1148_v45 }
 0x189   :  { %290 = vrot.lane.b32.xlu1 %v288_v2, %s927_s21  ;;  %v696_v2 = vmul.f32 %v694_v0, %v1148_v45  ;;  %s890_s29 = spop %889 }
 0x18a   :  { %v716_v3 = vstv %s890_s29 }
 0x18b   :  { %v718_v4 = vmul.f32 %v716_v3, %v1148_v45  ;;  %s892_s6 = spop %891 }
 0x18c   :  { %621 = vrot.lane.b32.xlu0 %v619_v5, %s926_s20 }
 0x18d   :  { %632 = vrot.lane.b32.xlu1 %v630_v13, %s927_s21 }
 0x190   :  { %461 = vrot.lane.b32.xlu0 %v459_v15, %s927_s21 }
 0x191   :  { %472 = vrot.lane.b32.xlu1 %v470_v16, %s928_s2 }
 0x194   :  { %301 = vrot.lane.b32.xlu0 %v299_v22, %s928_s2 }
 0x195   :  { %312 = vrot.lane.b32.xlu1 %v310_v24, %s929_s23 }
 0x198   :  { %643 = vrot.lane.b32.xlu0 %v641_v28, %s928_s2 }
 0x199   :  { %654 = vrot.lane.b32.xlu1 %v652_v30, %s929_s23 }
 0x19c   :  { %483 = vrot.lane.b32.xlu0 %v481_v32, %s929_s23 }
 0x19d   :  { %494 = vrot.lane.b32.xlu1 %v492_v33, %s930_s25 }
 0x1a0   :  { %323 = vrot.lane.b32.xlu0 %v321_v36, %s930_s25 }
 0x1a1   :  { %334 = vrot.lane.b32.xlu1 %v332_v37, %s931_s26 }
 0x1a4   :  { %665 = vrot.lane.b32.xlu0 %v663_v40, %s930_s25 }
 0x1a5   :  { %676 = vrot.lane.b32.xlu1 %v674_v42, %s931_s26 }
 0x1a8   :  { %505 = vrot.lane.b32.xlu0 %v503_v44, %s931_s26 }
 0x1a9   :  { %516 = vrot.lane.b32.xlu1 %v514_v58, %s932_s18 }
 0x1ac   :  { %345 = vrot.lane.b32.xlu0 %v1218_v7, %s932_s18  ;;  %v705_v7 = vstv %s888_s1 }
 0x1ad   :  { %356 = vrot.lane.b32.xlu1 %v1222_v8, %s933_s0  ;;  %v707_v8 = vmul.f32 %v705_v7, %v1148_v45 }
 0x1b0   :  { %687 = vrot.lane.b32.xlu0 %v685_v1, %s932_s18 }
 0x1b1   :  { %698 = vrot.lane.b32.xlu1 %v696_v2, %s933_s0 }
 0x1b4   :  { %527 = vrot.lane.b32.xlu0 %v1248_v18, %s933_s0 }
 0x1b5   :  { %538 = vrot.lane.b32.xlu1 %v1251_v19, %s934_s4 }
 0x1b8   :  { %367 = vrot.lane.b32.xlu0 %v1225_v9, %s934_s4  ;;  %v727_v9 = vstv %s892_s6 }
 0x1b9   :  { %378 = vrot.lane.b32.xlu1 %v1228_v10, %s935_s5  ;;  %v729_v10 = vmul.f32 %v727_v9, %v1148_v45 }
 0x1bc   :  { %709 = vrot.lane.b32.xlu0 %v707_v8, %s934_s4 }
 0x1bd   :  { %720 = vrot.lane.b32.xlu1 %v718_v4, %s935_s5 }
 0x1c0   :  { %549 = vrot.lane.b32.xlu0 %v1254_v21, %s935_s5 }
 0x1c1   :  { %560 = vrot.lane.b32.xlu1 %v1257_v23, %s936_s7 }
 0x1c4   :  { %389 = vrot.lane.b32.xlu0 %v1231_v11, %s936_s7 }
 0x1c5   :  { %78 = vrot.lane.b32.xlu1 %v1154_v47, %s1413_s28  ;;  %s937_s28 = smov 63  }
 0x1c8   :  { %731 = vrot.lane.b32.xlu0 %v729_v10, %s936_s7 }
 0x1c9   :  { %98 = vrot.lane.b32.xlu1 %v1160_v49, %s1415_s11  ;;  %s1419_s11 = sld [smem:[#allocation5_spill]] }
 0x1cc   :  { %88 = vrot.lane.b32.xlu0 %v1157_v48, %s1414_s30  ;;  %v214_v48 = vstv %s1418_s8 }
 0x1cd   :  { %118 = vrot.lane.b32.xlu1 %v1168_v51, %s926_s20  ;;  %v216_v49 = vmul.f32 %v214_v48, %v1148_v45 }
 0x1d0   :  { %108 = vrot.lane.b32.xlu0 %v1165_v50, %s925_s12 }
 0x1d1   :  { %138 = vrot.lane.b32.xlu1 %v1174_v53, %s928_s2 }
 0x1d4   :  { %128 = vrot.lane.b32.xlu0 %v1171_v52, %s927_s21 }
 0x1d5   :  { %158 = vrot.lane.b32.xlu1 %v1180_v55, %s930_s25 }
 0x1d6   :  { %v236_v50 = vpop.permute.xlu0 %235 }
 0x1d7   :  { %v407_v47 = vpop.permute.xlu1 %406  ;;  %v238_v20 = vadd.f32 %v236_v50, %v1203_v62 }
 0x1d8   :  { %148 = vrot.lane.b32.xlu0 %v1177_v54, %s929_s23  ;;  %v409_v16 = vadd.f32 %v407_v47, %v1236_v12 }
 0x1d9   :  { %178 = vrot.lane.b32.xlu1 %v1186_v57, %s932_s18 }
 0x1db   :  { %v247_v51 = vpop.permute.xlu1 %246 }
 0x1dc   :  { %168 = vrot.lane.b32.xlu0 %v1183_v56, %s931_s26  ;;  %v249_v26 = vadd.f32 %v247_v51, %v238_v20 }
 0x1dd   :  { %198 = vrot.lane.b32.xlu1 %v1195_v60, %s934_s4 }
 0x1e0   :  { %188 = vrot.lane.b32.xlu0 %v1192_v59, %s933_s0 }
 0x1e1   :  { %218 = vrot.lane.b32.xlu1 %v216_v49, %s936_s7 }
 0x1e4   :  { %208 = vrot.lane.b32.xlu0 %v1198_v61, %s935_s5 }
 0x1e6   :  { %v578_v52 = vpop.permute.xlu0 %577 }
 0x1e7   :  { %v589_v53 = vpop.permute.xlu1 %588  ;;  %v580_v27 = vadd.f32 %v578_v52, %v1260_v25 }
 0x1e9   :  { %v591_v32 = vadd.f32 %v589_v53, %v580_v27 }
 0x1ea   :  { %v418_v54 = vpop.permute.xlu0 %417 }
 0x1eb   :  { %v429_v55 = vpop.permute.xlu1 %428  ;;  %v420_v22 = vadd.f32 %v418_v54, %v409_v16 }
 0x1ed   :  { %v431_v29 = vadd.f32 %v429_v55, %v420_v22 }
 0x1ee   :  { %v258_v56 = vpop.permute.xlu0 %257 }
 0x1ef   :  { %v269_v57 = vpop.permute.xlu1 %268  ;;  %v260_v30 = vadd.f32 %v258_v56, %v249_v26 }
 0x1f1   :  { %v271_v35 = vadd.f32 %v269_v57, %v260_v30 }
 0x1f2   :  { %v600_v11 = vpop.permute.xlu0 %599 }
 0x1f3   :  { %v611_v60 = vpop.permute.xlu1 %610  ;;  %v602_v36 = vadd.f32 %v600_v11, %v591_v32 }
 0x1f5   :  { %v613_v40 = vadd.f32 %v611_v60, %v602_v36 }
 0x1f6   :  { %v440_v18 = vpop.permute.xlu0 %439 }
 0x1f7   :  { %v451_v19 = vpop.permute.xlu1 %450  ;;  %v442_v33 = vadd.f32 %v440_v18, %v431_v29 }
 0x1f9   :  { %v453_v38 = vadd.f32 %v451_v19, %v442_v33 }
 0x1fa   :  { %v280_v45 = vpop.permute.xlu0 %279 }
 0x1fb   :  { %v291_v21 = vpop.permute.xlu1 %290  ;;  %v282_v12 = vadd.f32 %v280_v45, %v271_v35 }
 0x1fd   :  { %v293_v42 = vadd.f32 %v291_v21, %v282_v12 }
 0x1fe   :  { %v622_v23 = vpop.permute.xlu0 %621 }
 0x1ff   :  { %v633_v59 = vpop.permute.xlu1 %632  ;;  %v624_v43 = vadd.f32 %v622_v23, %v613_v40 }
 0x201   :  { %v635_v0 = vadd.f32 %v633_v59, %v624_v43 }
 0x202   :  { %v462_v5 = vpop.permute.xlu0 %461 }
 0x203   :  { %v473_v6 = vpop.permute.xlu1 %472  ;;  %v464_v62 = vadd.f32 %v462_v5, %v453_v38 }
 0x205   :  { %v475_v25 = vadd.f32 %v473_v6, %v464_v62 }
 0x206   :  { %v302_v13 = vpop.permute.xlu0 %301 }
 0x207   :  { %v313_v14 = vpop.permute.xlu1 %312  ;;  %v304_v58 = vadd.f32 %v302_v13, %v293_v42 }
 0x209   :  { %v315_v7 = vadd.f32 %v313_v14, %v304_v58 }
 0x20a   :  { %v644_v15 = vpop.permute.xlu0 %643 }
 0x20b   :  { %v655_v61 = vpop.permute.xlu1 %654  ;;  %v646_v3 = vadd.f32 %v644_v15, %v635_v0 }
 0x20d   :  { %v657_v47 = vadd.f32 %v655_v61, %v646_v3 }
 0x20e   :  { %v484_v17 = vpop.permute.xlu0 %483 }
 0x20f   :  { %v495_v24 = vpop.permute.xlu1 %494  ;;  %v486_v1 = vadd.f32 %v484_v17, %v475_v25 }
 0x211   :  { %v497_v4 = vadd.f32 %v495_v24, %v486_v1 }
 0x212   :  { %v324_v28 = vpop.permute.xlu0 %323 }
 0x213   :  { %v335_v31 = vpop.permute.xlu1 %334  ;;  %v326_v9 = vadd.f32 %v324_v28, %v315_v7 }
 0x215   :  { %v337_v50 = vadd.f32 %v335_v31, %v326_v9 }
 0x216   :  { %v666_v34 = vpop.permute.xlu0 %665 }
 0x217   :  { %v677_v37 = vpop.permute.xlu1 %676  ;;  %v668_v51 = vadd.f32 %v666_v34, %v657_v47 }
 0x219   :  { %v679_v56 = vadd.f32 %v677_v37, %v668_v51 }
 0x21a   :  { %v506_v39 = vpop.permute.xlu0 %505 }
 0x21b   :  { %v517_v41 = vpop.permute.xlu1 %516  ;;  %v508_v48 = vadd.f32 %v506_v39, %v497_v4 }
 0x21d   :  { %v519_v53 = vadd.f32 %v517_v41, %v508_v48 }
 0x21e   :  { %v346_v44 = vpop.permute.xlu0 %345 }
 0x21f   :  { %v357_v63 = vpop.permute.xlu1 %356  ;;  %v348_v54 = vadd.f32 %v346_v44, %v337_v50 }
 0x221   :  { %v359_v60 = vadd.f32 %v357_v63, %v348_v54 }
 0x222   :  { %v688_v2 = vpop.permute.xlu0 %687 }
 0x223   :  { %v699_v8 = vpop.permute.xlu1 %698  ;;  %v690_v18 = vadd.f32 %v688_v2, %v679_v56 }
 0x225   :  { %v701_v59 = vadd.f32 %v699_v8, %v690_v18 }
 0x226   :  { %v528_v10 = vpop.permute.xlu0 %527 }
 0x227   :  { %v539_v49 = vpop.permute.xlu1 %538  ;;  %v530_v57 = vadd.f32 %v528_v10, %v519_v53 }
 0x229   :  { %v541_v45 = vadd.f32 %v539_v49, %v530_v57 }
 0x22a   :  { %v368_v52 = vpop.permute.xlu0 %367 }
 0x22b   :  { %v379_v55 = vpop.permute.xlu1 %378  ;;  %v370_v21 = vadd.f32 %v368_v52, %v359_v60 }
 0x22d   :  { %v381_v13 = vadd.f32 %v379_v55, %v370_v21 }
 0x22e   :  { %v710_v11 = vpop.permute.xlu0 %709 }
 0x22f   :  { %v721_v19 = vpop.permute.xlu1 %720  ;;  %v712_v14 = vadd.f32 %v710_v11, %v701_v59 }
 0x231   :  { %v723_v17 = vadd.f32 %v721_v19, %v712_v14 }
 0x232   :  { %v550_v23 = vpop.permute.xlu0 %549 }
 0x233   :  { %v552_v5 = vadd.f32 %v550_v23, %v541_v45  ;;  %v561_v6 = vpop.permute.xlu1 %560 }
 0x235   :  { %v563_v15 = vadd.f32 %v561_v6, %v552_v5 }
 0x236   :  { %v390_v61 = vpop.permute.xlu0 %389 }
 0x237   :  { %v392_v16 = vadd.f32 %v390_v61, %v381_v13  ;;  %740 = vrot.lane.b32.xlu1 %v563_v15, %s1414_s30  ;;  %v79_v24 = vpop.permute.xlu1 %78 }
 0x238   :  { %v81_v27 = vadd.f32 %v79_v24, %v1151_v46 }
 0x239   :  { %736 = vrot.lane.b32.xlu0 %v392_v16, %s937_s28 }
 0x23a   :  { %v732_v20 = vpop.permute.xlu0 %731 }
 0x23b   :  { %v734_v22 = vadd.f32 %v732_v20, %v723_v17  ;;  %v99_v29 = vpop.permute.xlu1 %98 }
 0x23d   :  { %744 = vrot.lane.b32.xlu0 %v734_v22, %s938_s9 }
 0x23e   :  { %v89_v26 = vpop.permute.xlu0 %88 }
 0x23f   :  { %v91_v28 = vadd.f32 %v89_v26, %v81_v27  ;;  %v119_v33 = vpop.permute.xlu1 %118 }
 0x241   :  { %v101_v30 = vadd.f32 %v99_v29, %v91_v28 }
 0x242   :  { %v109_v31 = vpop.permute.xlu0 %108 }
 0x243   :  { %v111_v32 = vadd.f32 %v109_v31, %v101_v30  ;;  %v139_v37 = vpop.permute.xlu1 %138 }
 0x245   :  { %v121_v34 = vadd.f32 %v119_v33, %v111_v32 }
 0x246   :  { %v129_v35 = vpop.permute.xlu0 %128 }
 0x247   :  { %v131_v36 = vadd.f32 %v129_v35, %v121_v34  ;;  %v159_v40 = vpop.permute.xlu1 %158 }
 0x249   :  { %v141_v38 = vadd.f32 %v139_v37, %v131_v36 }
 0x24a   :  { %v149_v12 = vpop.permute.xlu0 %148 }
 0x24b   :  { %v151_v39 = vadd.f32 %v149_v12, %v141_v38  ;;  %v179_v43 = vpop.permute.xlu1 %178 }
 0x24d   :  { %v161_v62 = vadd.f32 %v159_v40, %v151_v39 }
 0x24e   :  { %v169_v41 = vpop.permute.xlu0 %168 }
 0x24f   :  { %v171_v42 = vadd.f32 %v169_v41, %v161_v62  ;;  %v199_v58 = vpop.permute.xlu1 %198 }
 0x251   :  { %v181_v44 = vadd.f32 %v179_v43, %v171_v42 }
 0x252   :  { %v189_v46 = vpop.permute.xlu0 %188 }
 0x253   :  { %v191_v25 = vadd.f32 %v189_v46, %v181_v44  ;;  %v219_v2 = vpop.permute.xlu1 %218 }
 0x255   :  { %v201_v63 = vadd.f32 %v199_v58, %v191_v25 }
 0x256   :  { %v209_v0 = vpop.permute.xlu0 %208 }
 0x257   :  { %v211_v1 = vadd.f32 %v209_v0, %v201_v63 }
 0x259   :  { %v221_v7 = vadd.f32 %v219_v2, %v211_v1 }
 0x2a9   :  { %v741_v4 = vpop.permute.xlu1 %740 }
 0x2ab   :  { %v737_v3 = vpop.permute.xlu0 %736 }
 0x2ac   :  { %v748_v8 = vsel %vm747_vm2, %v221_v7, %v737_v3 }
 0x2ad   :  { %v750_v10 = vsel %vm749_vm3, %v748_v8, %v741_v4 }
 0x2af   :  { %v745_v9 = vpop.permute.xlu0 %744 }
 0x2b0   :  { %v752_v47 = vsel %vm751_vm4, %v741_v4, %v745_v9 }
 0x2b1   :  { %v755_v48 = vcombine.low %v750_v10, %v752_v47 }
 0x2b3   :  { %760 = vst.msk [vmem:[%s1419_s11] sm:$0xff] %vm759_vm7, %v755_v48 }

</bundles_post_ra>
